<compile_context>
chip_gen: v5e
topology: v5e:2x2
jax: 0.10.0
libtpu: 0.0.40
codegen_flags: <defaults>
</compile_context>

<pallas_src>
import functools

import jax
import jax.numpy as jnp
from jax.experimental import pallas as pl
from jax.experimental.pallas import tpu as pltpu


# ----------------------------------------------------------------------------
# helpers
# ----------------------------------------------------------------------------

def _row_tile(m: int) -> int:
    """Row-tile that evenly divides m and respects the (8, 128) block rule."""
    if m <= 512:
        return m                      # full extent — always legal
    for t in (512, 256, 128, 64, 32, 16, 8):
        if m % t == 0:
            return t
    return m


def _gelu(x):
    # TODO(synk): PyTorch nn.GELU() is erf-exact; tanh approximation used here
    # (guaranteed EUP lowering; numerical difference is tiny).
    return jax.nn.gelu(x, approximate=True)


# ----------------------------------------------------------------------------
# kernel bodies
# ----------------------------------------------------------------------------

def _linear_kernel(x_ref, w_ref, b_ref, o_ref, *, activation=None):
    y = jnp.dot(x_ref[...], w_ref[...], preferred_element_type=jnp.float32)
    y = y + b_ref[...].astype(jnp.float32)
    if activation is not None:
        y = activation(y)
    o_ref[...] = y.astype(o_ref.dtype)


def _linear_res_stats_kernel(x_ref, w_ref, b_ref, r_ref,
                             y_ref, sum_ref, ssq_ref):
    """y = x @ w + b + residual, and accumulate the per-feature BatchNorm1d
    statistics (sum, sum-of-squares over all rows) so the surrounding
    Transpose(1,2)/BatchNorm1d/Transpose(1,2) never touches HBM in a
    transposed layout."""
    @pl.when(pl.program_id(0) == 0)
    def _():
        sum_ref[...] = jnp.zeros_like(sum_ref)
        ssq_ref[...] = jnp.zeros_like(ssq_ref)

    y = jnp.dot(x_ref[...], w_ref[...], preferred_element_type=jnp.float32)
    y = y + b_ref[...].astype(jnp.float32) + r_ref[...].astype(jnp.float32)
    y_ref[...] = y.astype(y_ref.dtype)

    sum_ref[...] += jnp.sum(y, axis=0, keepdims=True)
    ssq_ref[...] += jnp.sum(y * y, axis=0, keepdims=True)


def _bn_apply_kernel(y_ref, sum_ref, ssq_ref, g_ref, b_ref, o_ref,
                     *, n_rows, eps):
    inv_n = 1.0 / float(n_rows)
    mean = sum_ref[...] * inv_n                       # (1, D)
    var = ssq_ref[...] * inv_n - mean * mean          # biased var (train mode)
    inv_std = jax.lax.rsqrt(var + eps)
    yn = (y_ref[...].astype(jnp.float32) - mean) * inv_std
    o_ref[...] = (yn * g_ref[...] + b_ref[...]).astype(o_ref.dtype)


def _attn_kernel(qkv_ref, o_ref, *, n_heads, d_k, d_v, scale):
    """Scaled dot-product attention for one batch element, all heads.

    Input ref is the fused QKV projection in [S, 2*H*d_k + H*d_v] layout; the
    PyTorch head-split transposes are expressed as static lane slices and the
    K permute as dot_general contraction dims — nothing is re-laid-out in HBM.
    """
    qkv = qkv_ref[...]
    h_dk = n_heads * d_k
    q_all = qkv[:, :h_dk].astype(jnp.float32)
    k_all = qkv[:, h_dk:2 * h_dk].astype(jnp.float32)
    v_all = qkv[:, 2 * h_dk:2 * h_dk + n_heads * d_v].astype(jnp.float32)

    for h in range(n_heads):
        q = q_all[:, h * d_k:(h + 1) * d_k]
        k = k_all[:, h * d_k:(h + 1) * d_k]
        v = v_all[:, h * d_v:(h + 1) * d_v]
        # q @ k^T via contraction dims (folds the .permute(0,2,3,1) of K).
        s = jax.lax.dot_general(q, k, (((1,), (1,)), ((), ())),
                                preferred_element_type=jnp.float32) * scale
        s = s - jnp.max(s, axis=-1, keepdims=True)
        p = jnp.exp(s)
        p = p / jnp.sum(p, axis=-1, keepdims=True)
        oh = jnp.dot(p, v, preferred_element_type=jnp.float32)
        # Output already lands in [S, H*d_v] layout, i.e. the PyTorch
        # output.transpose(1,2).contiguous().view(bs,-1,H*d_v) for free.
        o_ref[:, h * d_v:(h + 1) * d_v] = oh.astype(o_ref.dtype)


# ----------------------------------------------------------------------------
# pallas_call wrappers
# ----------------------------------------------------------------------------

def _linear(x, w, b, activation=None):
    m, k = x.shape
    n = w.shape[1]
    tm = _row_tile(m)
    kernel = functools.partial(_linear_kernel, activation=activation)
    return pl.pallas_call(
        kernel,
        out_shape=jax.ShapeDtypeStruct((m, n), x.dtype),
        grid_spec=pltpu.PrefetchScalarGridSpec(
            num_scalar_prefetch=0,
            grid=(m // tm,),
            in_specs=[pl.BlockSpec((tm, k), lambda i: (i, 0)),
                      pl.BlockSpec((k, n), lambda i: (0, 0)),
                      pl.BlockSpec((1, n), lambda i: (0, 0))],
            out_specs=pl.BlockSpec((tm, n), lambda i: (i, 0)),
        ),
        compiler_params=pltpu.CompilerParams(
            dimension_semantics=("parallel",)),
        cost_estimate=pl.CostEstimate(
            flops=2 * m * k * n, transcendentals=0,
            bytes_accessed=(m * k + k * n + n + m * n) * x.dtype.itemsize),
    )(x, w, b.reshape(1, n))


def _linear_res_stats(x, w, b, res):
    m, k = x.shape
    n = w.shape[1]
    tm = _row_tile(m)
    return pl.pallas_call(
        _linear_res_stats_kernel,
        out_shape=(jax.ShapeDtypeStruct((m, n), x.dtype),
                   jax.ShapeDtypeStruct((1, n), jnp.float32),
                   jax.ShapeDtypeStruct((1, n), jnp.float32)),
        grid_spec=pltpu.PrefetchScalarGridSpec(
            num_scalar_prefetch=0,
            grid=(m // tm,),
            in_specs=[pl.BlockSpec((tm, k), lambda i: (i, 0)),
                      pl.BlockSpec((k, n), lambda i: (0, 0)),
                      pl.BlockSpec((1, n), lambda i: (0, 0)),
                      pl.BlockSpec((tm, n), lambda i: (i, 0))],
            out_specs=[pl.BlockSpec((tm, n), lambda i: (i, 0)),
                       pl.BlockSpec((1, n), lambda i: (0, 0)),
                       pl.BlockSpec((1, n), lambda i: (0, 0))],
        ),
        # stats outputs are resident accumulators across row tiles
        compiler_params=pltpu.CompilerParams(
            dimension_semantics=("arbitrary",)),
        cost_estimate=pl.CostEstimate(
            flops=2 * m * k * n, transcendentals=0,
            bytes_accessed=(m * k + k * n + n + 2 * m * n) * x.dtype.itemsize),
    )(x, w, b.reshape(1, n), res)


def _bn_apply(y, ssum, ssq, gamma, beta, eps):
    m, n = y.shape
    tm = _row_tile(m)
    kernel = functools.partial(_bn_apply_kernel, n_rows=m, eps=eps)
    return pl.pallas_call(
        kernel,
        out_shape=jax.ShapeDtypeStruct((m, n), y.dtype),
        grid_spec=pltpu.PrefetchScalarGridSpec(
            num_scalar_prefetch=0,
            grid=(m // tm,),
            in_specs=[pl.BlockSpec((tm, n), lambda i: (i, 0)),
                      pl.BlockSpec((1, n), lambda i: (0, 0)),
                      pl.BlockSpec((1, n), lambda i: (0, 0)),
                      pl.BlockSpec((1, n), lambda i: (0, 0)),
                      pl.BlockSpec((1, n), lambda i: (0, 0))],
            out_specs=pl.BlockSpec((tm, n), lambda i: (i, 0)),
        ),
        compiler_params=pltpu.CompilerParams(
            dimension_semantics=("parallel",)),
        cost_estimate=pl.CostEstimate(
            flops=5 * m * n, transcendentals=0,
            bytes_accessed=2 * m * n * y.dtype.itemsize),
    )(y, ssum, ssq, gamma.reshape(1, n), beta.reshape(1, n))


def _attention(qkv3d, n_heads, d_k, d_v, scale, out_dtype):
    bsz, s, w = qkv3d.shape
    h_dv = n_heads * d_v
    kernel = functools.partial(_attn_kernel, n_heads=n_heads,
                               d_k=d_k, d_v=d_v, scale=scale)
    return pl.pallas_call(
        kernel,
        out_shape=jax.ShapeDtypeStruct((bsz, s, h_dv), out_dtype),
        grid_spec=pltpu.PrefetchScalarGridSpec(
            num_scalar_prefetch=0,
            grid=(bsz,),
            in_specs=[pl.BlockSpec((None, s, w), lambda b: (b, 0, 0))],
            out_specs=pl.BlockSpec((None, s, h_dv), lambda b: (b, 0, 0)),
        ),
        compiler_params=pltpu.CompilerParams(
            dimension_semantics=("parallel",)),
        cost_estimate=pl.CostEstimate(
            flops=2 * bsz * n_heads * s * s * (d_k + d_v),
            transcendentals=bsz * n_heads * s * s,
            bytes_accessed=(bsz * s * (w + h_dv)) * qkv3d.dtype.itemsize),
    )(qkv3d)


# ----------------------------------------------------------------------------
# the encoder layer (default config of the PyTorch TSTEncoderLayer)
# ----------------------------------------------------------------------------

class TSTEncoderLayerPallas:
    """Pallas forward of TSTEncoderLayer with the default configuration:
    post-norm, norm='BatchNorm' (training-mode batch statistics), dropout=0,
    res_attention=False, activation=GELU.
    """
    # TODO(synk): dropout>0, res_attention/prev, pre_norm, 'LayerNorm' option,
    # attn_mask / key_padding_mask and BatchNorm running-stat updates are not
    # implemented (all are inactive in the module's default forward).

    def __init__(self, key, q_len, d_model, n_heads, d_k=None, d_v=None,
                 d_ff=256, eps=1e-5, dtype=jnp.float32):
        assert d_model % n_heads == 0
        d_k = d_model // n_heads if d_k is None else d_k
        d_v = d_model // n_heads if d_v is None else d_v
        assert d_k == d_v, "kernel assumes d_k == d_v (PatchTST default)"
        self.n_heads, self.d_k, self.d_v = n_heads, d_k, d_v
        self.d_model, self.d_ff, self.eps = d_model, d_ff, eps
        self.scale = float((d_model // n_heads) ** -0.5)

        ks = jax.random.split(key, 4)

        def init(k, fan_in, shape):
            lim = 1.0 / (fan_in ** 0.5)
            return jax.random.uniform(k, shape, dtype, minval=-lim, maxval=lim)

        h_dk, h_dv = n_heads * d_k, n_heads * d_v
        # fused QKV projection: [d_model, 2*H*d_k + H*d_v]
        self.w_qkv = init(ks[0], d_model, (d_model, 2 * h_dk + h_dv))
        self.b_qkv = jnp.zeros((2 * h_dk + h_dv,), dtype)
        self.w_o = init(ks[1], h_dv, (h_dv, d_model))
        self.b_o = jnp.zeros((d_model,), dtype)
        self.w_ff1 = init(ks[2], d_model, (d_model, d_ff))
        self.b_ff1 = jnp.zeros((d_ff,), dtype)
        self.w_ff2 = init(ks[3], d_ff, (d_ff, d_model))
        self.b_ff2 = jnp.zeros((d_model,), dtype)
        # fresh nn.BatchNorm1d affine params
        self.g1 = jnp.ones((d_model,), jnp.float32)
        self.be1 = jnp.zeros((d_model,), jnp.float32)
        self.g2 = jnp.ones((d_model,), jnp.float32)
        self.be2 = jnp.zeros((d_model,), jnp.float32)

    def __call__(self, src):
        # src: [B, q_len, d_model]
        B, S, D = src.shape
        x2 = src.reshape(B * S, D)

        # ---- multi-head self-attention ----
        qkv = _linear(x2, self.w_qkv, self.b_qkv)
        attn = _attention(qkv.reshape(B, S, -1), self.n_heads, self.d_k,
                          self.d_v, self.scale, src.dtype)
        attn2 = attn.reshape(B * S, self.n_heads * self.d_v)

        # output projection + residual add + BatchNorm stats, fused
        y1, s1, q1 = _linear_res_stats(attn2, self.w_o, self.b_o, x2)
        z1 = _bn_apply(y1, s1, q1, self.g1, self.be1, self.eps)

        # ---- position-wise feed-forward ----
        h = _linear(z1, self.w_ff1, self.b_ff1, activation=_gelu)
        y2, s2, q2 = _linear_res_stats(h, self.w_ff2, self.b_ff2, z1)
        z2 = _bn_apply(y2, s2, q2, self.g2, self.be2, self.eps)

        return z2.reshape(B, S, D)


# ----------------------------------------------------------------------------
# pure-JAX reference (same math, same parameters)
# ----------------------------------------------------------------------------

def _reference_forward(layer, src):
    B, S, D = src.shape
    H, dk, dv = layer.n_heads, layer.d_k, layer.d_v
    x2 = src.reshape(B * S, D).astype(jnp.float32)

    qkv = x2 @ layer.w_qkv + layer.b_qkv
    h_dk = H * dk
    q = qkv[:, :h_dk].reshape(B, S, H, dk).transpose(0, 2, 1, 3)
    k = qkv[:, h_dk:2 * h_dk].reshape(B, S, H, dk).transpose(0, 2, 1, 3)
    v = qkv[:, 2 * h_dk:].reshape(B, S, H, dv).transpose(0, 2, 1, 3)
    scores = jnp.einsum('bhqd,bhkd->bhqk', q, k) * layer.scale
    attn = jax.nn.softmax(scores, axis=-1)
    out = jnp.einsum('bhqk,bhkd->bhqd', attn, v)
    out = out.transpose(0, 2, 1, 3).reshape(B * S, H * dv)

    def bn(y, g, b):
        mean = jnp.mean(y, axis=0, keepdims=True)
        var = jnp.mean(y * y, axis=0, keepdims=True) - mean * mean
        return (y - mean) * jax.lax.rsqrt(var + layer.eps) * g + b

    y1 = out @ layer.w_o + layer.b_o + x2
    z1 = bn(y1, layer.g1, layer.be1)
    hdn = jax.nn.gelu(z1 @ layer.w_ff1 + layer.b_ff1, approximate=True)
    y2 = hdn @ layer.w_ff2 + layer.b_ff2 + z1
    z2 = bn(y2, layer.g2, layer.be2)
    return z2.reshape(B, S, D).astype(src.dtype)


if __name__ == "__main__":
    key = jax.random.PRNGKey(0)
    k_param, k_x = jax.random.split(key)

    # small shapes consistent with a PatchTST encoder layer
    B, S, d_model, n_heads, d_ff = 2, 8, 32, 4, 64
    layer = TSTEncoderLayerPallas(k_param, q_len=S, d_model=d_model,
                                  n_heads=n_heads, d_ff=d_ff)
    x = jax.random.normal(k_x, (B, S, d_model), dtype=jnp.float32)

    out = layer(x)
    out = jax.block_until_ready(out)

    ref = _reference_forward(layer, x)
    assert out.shape == (B, S, d_model), out.shape
    assert out.dtype == x.dtype
    max_err = float(jnp.max(jnp.abs(out - ref)))
    # tolerance covers MXU f32 multi-pass rounding differences vs XLA
    assert jnp.allclose(out, ref, atol=1e-2, rtol=1e-2), max_err

    print("KERNEL_OK")
</pallas_src>

<mosaic_0001>
module attributes {stable_mosaic.version = 11 : i64} {
  func.func @_linear_kernel(%arg0: i32, %arg1: memref<16x32xf32, #tpu.memory_space<vmem>>, %arg2: memref<32x96xf32, #tpu.memory_space<vmem>>, %arg3: memref<1x96xf32, #tpu.memory_space<vmem>>, %arg4: memref<16x96xf32, #tpu.memory_space<vmem>>) attributes {dimension_semantics = [#tpu.dimension_semantics<parallel>], iteration_bounds = array<i64: 1>, scalar_prefetch = 0 : i64, scratch_operands = 0 : i64, tpu.core_type = #tpu.core_type<tc>, window_params = [{transform_indices = @transform_0, window_bounds = array<i64: 16, 32>}, {pipeline_mode = #tpu.pipeline_mode<synchronous>, transform_indices = @transform_1, window_bounds = array<i64: 32, 96>}, {pipeline_mode = #tpu.pipeline_mode<synchronous>, transform_indices = @transform_2, window_bounds = array<i64: 1, 96>}, {transform_indices = @transform_3, window_bounds = array<i64: 16, 96>}]} {
    %c0 = arith.constant 0 : index
    %c0_0 = arith.constant 0 : index
    %0 = vector.load %arg1[%c0, %c0_0] : memref<16x32xf32, #tpu.memory_space<vmem>>, vector<16x32xf32>
    %c0_1 = arith.constant 0 : index
    %c0_2 = arith.constant 0 : index
    %1 = vector.load %arg2[%c0_1, %c0_2] : memref<32x96xf32, #tpu.memory_space<vmem>>, vector<32x96xf32>
    %cst = arith.constant dense<0.000000e+00> : vector<16x96xf32>
    %2 = tpu.matmul %0, %1, %cst {dimension_numbers = #tpu.dot_dimension_numbers<[1], [0], [0], [1], [0, 0, 1, 1], [], []>} : vector<16x32xf32>, vector<32x96xf32>, vector<16x96xf32> -> vector<16x96xf32>
    %c0_3 = arith.constant 0 : index
    %c0_4 = arith.constant 0 : index
    %3 = vector.load %arg3[%c0_3, %c0_4] : memref<1x96xf32, #tpu.memory_space<vmem>>, vector<1x96xf32>
    %4 = vector.broadcast %3 : vector<1x96xf32> to vector<16x96xf32>
    %5 = arith.addf %2, %4 : vector<16x96xf32>
    %c0_5 = arith.constant 0 : index
    %c0_6 = arith.constant 0 : index
    %6 = vector.load %arg4[%c0_5, %c0_6] : memref<16x96xf32, #tpu.memory_space<vmem>>, vector<16x96xf32>
    tpu.vector_store %arg4[%c0_5, %c0_6], %5 {strides = array<i32>} : memref<16x96xf32, #tpu.memory_space<vmem>>, vector<16x96xf32>,
    return
  }
  func.func @transform_0(%arg0: i32) -> (i32, i32) {
    %c0_i32 = arith.constant 0 : i32
    %c0_i32_0 = arith.constant 0 : i32
    return %arg0, %c0_i32 : i32, i32
  }
  func.func @transform_1(%arg0: i32) -> (i32, i32) {
    %c0_i32 = arith.constant 0 : i32
    %c0_i32_0 = arith.constant 0 : i32
    %c0_i32_1 = arith.constant 0 : i32
    return %c0_i32, %c0_i32_0 : i32, i32
  }
  func.func @transform_2(%arg0: i32) -> (i32, i32) {
    %c0_i32 = arith.constant 0 : i32
    %c0_i32_0 = arith.constant 0 : i32
    %c0_i32_1 = arith.constant 0 : i32
    return %c0_i32, %c0_i32_0 : i32, i32
  }
  func.func @transform_3(%arg0: i32) -> (i32, i32) {
    %c0_i32 = arith.constant 0 : i32
    %c0_i32_0 = arith.constant 0 : i32
    return %arg0, %c0_i32 : i32, i32
  }
}

</mosaic_0001>

<bundles_post_ra>
// kernel: tpu_custom_call.1
= control target key start
LH: loop header
LB: loop body
LE: loop exit
PB: predicated region body
PF: predicated region fallthrough
CT: control target
= control target key end

     0   :  { %8 = vsyncpa [#allocation3], 0  ;;  %s246_s0 = inlined_call_operand.hbm [shape: f32[16,32], index: 0, kind: input, shape index: {}]   ;;  %s247_s1 = inlined_call_operand.hbm [shape: f32[32,96], index: 1, kind: input, shape index: {}]   ;;  %s248_s2 = inlined_call_operand.vmem [shape: f32[1,96], index: 2, kind: input, shape index: {}]   ;;  %s249_s3 = inlined_call_operand.hbm [shape: f32[16,96], index: 3, kind: output, shape index: {}]  }
   0x1   :  { %9 = vsyncpa [#allocation6], 0 }
   0x2   :  { %10 = vsyncpa [#allocation4], 0  ;;  %s15_s14 = sshll.u32 %s246_s0, 4  ;;  %s200_s15 = smov [#allocation2]   ;;  %s16_s14 = int_to_ptr.hbm [resolvable:$true] %s15_s14 }
   0x3   :  { %s17_s16 = sshll.u32 %s200_s15, 4  ;;  %s28_s19 = sshll.u32 %s247_s1, 4  ;;  %s18_s16 = int_to_ptr.vmem [resolvable:$true] %s17_s16  ;;  %s29_s19 = int_to_ptr.hbm [resolvable:$true] %s28_s19 }
   0x4   :  { %s201_s20 = smov 128   ;;  %s202_s21 = smov 8  }
   0x5   :  { %23 = dma.hbm_to_vmem [thread:$0]  %s16_s14, 256, %s18_s16, [#allocation3], %s201_s20, %s201_s20, %s202_s21  }
   0x6   :  { %s203_s22 = smov [#allocation5]  }
   0x7   :  { %s30_s23 = sshll.u32 %s203_s22, 4  ;;  %s31_s23 = int_to_ptr.vmem [resolvable:$true] %s30_s23 }
   0x8   :  { %36 = dma.hbm_to_vmem [thread:$0]  %s29_s19, 512, %s31_s23, [#allocation6], %s201_s20, %s201_s20, %s202_s21  }
   0x9   :  { %194 = dma.done.wait [#allocation3], 256  }
   0xa   :  { %195 = vsyncadd [#allocation3], 4294967040 }
   0xb   :  { %196 = dma.done.wait [#allocation6], 512  }
   0xc   :  { %197 = vsyncadd [#allocation6], 4294966784  ;;  %v52_v0 = vld [vmem:[#allocation5 + $0x18] sm:$0xff]  ;;  %v51_v1 = vld [vmem:[#allocation5 + $0x10] sm:$0xff]  ;;  %vm57_vm0 = vcmask 261120   ;;  %s204_s24 = smov [#allocation7]  }
   0xd   :  { %76 = vmatpush.msra.mxu0 %v52_v0  ;;  %112 = vmatpush.msra.mxu1 %v52_v0  ;;  %v50_v2 = vld [vmem:[#allocation5 + $0x8] sm:$0xff]  ;;  %v49_v3 = vld [vmem:[#allocation5] sm:$0xff]  ;;  %v47_v4 = vld [vmem:[#allocation2] sm:$0xff]  ;;  %s94_s25 = sshll.u32 %s204_s24, 4  ;;  %s96_s28 = sshll.u32 %s249_s3, 4  ;;  %vm87_vm1 = vcmask 785408   ;;  %s95_s25 = int_to_ptr.vmem [resolvable:$true] %s94_s25  ;;  %s97_s28 = int_to_ptr.hbm [resolvable:$true] %s96_s28 }
   0xe   :  { %v48_v5 = vld [vmem:[#allocation2 + $0x8] sm:$0xff]  ;;  %v121_v6 = vld [vmem:[%s248_s2] ss:$0 sm:$0xff] }
   0xf   :  { %77 = vmatpush.msra.mxu0 %v51_v1  ;;  %113 = vmatpush.msra.mxu1 %v51_v1 }
  0x11   :  { %78 = vmatpush.msra.mxu0 %v50_v2  ;;  %114 = vmatpush.msra.mxu1 %v50_v2 }
  0x13   :  { %79 = vmatpush.msra.mxu0 %v49_v3  ;;  %115 = vmatpush.msra.mxu1 %v49_v3 }
  0x14   :  { %110 = vmatmul.msk.f32.vlgmr.msra.gmra.mxu0 %vm57_vm0, %v47_v4  ;;  %111 = vmatmul.msk.f32.vlgmr.msra.gmra.mxu1 %vm57_vm0, %v48_v5 }
  0x91   :  { %v81_v7 = vpop.f32.mrf.mxu0  ;;  %v84_v8 = vpop.f32.mrf.mxu1 }
  0x92   :  { %v82_v9 = vadd.f32 %v121_v6, %v81_v7  ;;  %v85_v10 = vadd.f32 %v121_v6, %v84_v8 }
  0x94   :  { %88 = vst.msk [vmem:[#allocation7] sm:$0xff] %vm87_vm1, %v82_v9 }
  0x95   :  { %89 = vst.msk [vmem:[#allocation7 + $0x8] sm:$0xff] %vm87_vm1, %v85_v10 }
  0x96   :  { %102 = dma.vmem_to_hbm [thread:$0]  %s95_s25, 256, %s97_s28, [#allocation4], %s201_s20, %s201_s20, %s202_s21  }
  0x97   :  { %198 = dma.done.wait [#allocation4], 256  }
  0x98   :  { %199 = vsyncadd [#allocation4], 4294967040 }
  0x99   :  { %107 = vsyncpa [#allocation3], 1 }
  0x9a   :  { %108 = vsyncpa [#allocation6], 1 }
  0x9b   :  { %109 = vsyncpa [#allocation4], 1 }

</bundles_post_ra>
